<compile_context>
chip_gen: v6e
topology: v6e:2x2x1
jax: 0.10.0
libtpu: 0.0.40
codegen_flags: <defaults>
</compile_context>

<pallas_src>
import jax
import jax.numpy as jnp
from jax.experimental import pallas as pl
from jax.experimental.pallas import tpu as pltpu


def _round_up(x, m):
    return ((x + m - 1) // m) * m


def _tc_per_chip():
    """Best-effort TensorCores-per-chip (2 on v4/v5p megacore and v7x)."""
    try:
        kind = jax.devices()[0].device_kind.lower()
    except Exception:
        return 1
    for tag in ("v7", "v5p", "v4"):
        if tag in kind:
            return 2
    return 1


def _make_kernel(action_dim, hidden_pad, h2p, out_pad, split_layer2,
                 compute_dtype):
    """One batch tile of the fused pi/v MLP.

    Layer 1 (shared input) and layer 3 (head) are lane-fused; layer 2 is
    block-diagonal for small H and split into two real matmuls for H >= 128.
    Matmul inputs are `compute_dtype` (bf16 in production), accumulation and
    tanh are f32.  (TODO(synk): bf16 tanh on v6e/v7x if EUP ever saturates.)
    """

    def kernel(obs_ref, w1_ref, w2_ref, w3_ref, b_ref, mean_ref, value_ref):
        x = obs_ref[...]
        # Layer 1: [pi | v] fused output lanes.
        h = jnp.tanh(
            jnp.dot(x, w1_ref[...], preferred_element_type=jnp.float32)
            + b_ref[0:1, :h2p])
        h = h.astype(compute_dtype)

        # Layer 2.
        if split_layer2:
            g_pi = jnp.tanh(
                jnp.dot(h[:, :hidden_pad], w2_ref[0],
                        preferred_element_type=jnp.float32)
                + b_ref[1:2, :hidden_pad])
            g_v = jnp.tanh(
                jnp.dot(h[:, hidden_pad:], w2_ref[1],
                        preferred_element_type=jnp.float32)
                + b_ref[1:2, hidden_pad:h2p])
            g = jnp.concatenate([g_pi, g_v], axis=1).astype(compute_dtype)
        else:
            g = jnp.tanh(
                jnp.dot(h, w2_ref[...], preferred_element_type=jnp.float32)
                + b_ref[1:2, :h2p]).astype(compute_dtype)

        # Layer 3: fused [mean | value | 0...] head (f32 result).
        out = (jnp.dot(g, w3_ref[...], preferred_element_type=jnp.float32)
               + b_ref[2:3, :out_pad])
        mean_ref[...] = out[:, :action_dim]
        value_ref[...] = out[:, action_dim:action_dim + 1]

    return kernel


def pack_fused_params(params, obs_dim, hidden, action_dim, *,
                      compute_dtype=jnp.bfloat16, split_layer2=None):
    """Fuse pi/v layers into 3 lane-padded weights + one stacked bias array."""
    if split_layer2 is None:
        split_layer2 = hidden >= 128
    out_pad = _round_up(action_dim + 1, 128)

    if split_layer2:
        hidden_pad = _round_up(hidden, 128)   # pi lanes [0:Hp), v lanes [Hp:2Hp)
        h2p = 2 * hidden_pad
    else:
        hidden_pad = hidden                   # pi lanes [0:H), v lanes [H:2H)
        h2p = _round_up(2 * hidden, 128)
    pi0, v0 = 0, hidden_pad

    w1 = jnp.zeros((obs_dim, h2p), jnp.float32)
    w1 = w1.at[:, pi0:pi0 + hidden].set(params["pi_w1"])
    w1 = w1.at[:, v0:v0 + hidden].set(params["v_w1"])

    if split_layer2:
        w2 = jnp.zeros((2, hidden_pad, hidden_pad), jnp.float32)
        w2 = w2.at[0, :hidden, :hidden].set(params["pi_w2"])
        w2 = w2.at[1, :hidden, :hidden].set(params["v_w2"])
    else:
        w2 = jnp.zeros((h2p, h2p), jnp.float32)
        w2 = w2.at[pi0:pi0 + hidden, pi0:pi0 + hidden].set(params["pi_w2"])
        w2 = w2.at[v0:v0 + hidden, v0:v0 + hidden].set(params["v_w2"])

    w3 = jnp.zeros((h2p, out_pad), jnp.float32)
    w3 = w3.at[pi0:pi0 + hidden, :action_dim].set(params["pi_w3"])
    w3 = w3.at[v0:v0 + hidden, action_dim:action_dim + 1].set(params["v_w3"])

    # Biases stacked into a single (3, W) f32 array (one DMA stream).
    bw = max(h2p, out_pad)
    b = jnp.zeros((3, bw), jnp.float32)
    b = b.at[0, pi0:pi0 + hidden].set(params["pi_b1"].reshape(-1))
    b = b.at[0, v0:v0 + hidden].set(params["v_b1"].reshape(-1))
    b = b.at[1, pi0:pi0 + hidden].set(params["pi_b2"].reshape(-1))
    b = b.at[1, v0:v0 + hidden].set(params["v_b2"].reshape(-1))
    b = b.at[2, :action_dim].set(params["pi_b3"].reshape(-1))
    b = b.at[2, action_dim:action_dim + 1].set(params["v_b3"].reshape(-1))

    return {"w1": w1.astype(compute_dtype), "w2": w2.astype(compute_dtype),
            "w3": w3.astype(compute_dtype), "b": b,
            "obs_dim": obs_dim, "hidden": hidden, "action_dim": action_dim,
            "hidden_pad": hidden_pad, "h2p": h2p, "out_pad": out_pad,
            "split_layer2": split_layer2, "compute_dtype": compute_dtype}


def ppo_forward(obs, fused, log_std, *, tb_max=512, single_buffer_weights=None):
    """Returns (dist_mean, dist_std, value) == Normal(mu, std) params + v."""
    B, obs_dim = obs.shape
    A = fused["action_dim"]
    hidden_pad, h2p, out_pad = fused["hidden_pad"], fused["h2p"], fused["out_pad"]
    split, cdt = fused["split_layer2"], fused["compute_dtype"]

    # Batch tiling: bound padding waste, and give multi-TC chips (v7x) >= 2
    # grid steps so the "parallel" axis can actually be sharded.
    num_tiles = max(pl.cdiv(B, tb_max), _tc_per_chip())
    TB = _round_up(pl.cdiv(B, num_tiles), 8)
    B_pad = num_tiles * TB
    if B_pad != B:
        obs = jnp.pad(obs, ((0, B_pad - B), (0, 0)))
    obs = obs.astype(cdt)

    weight_bytes = (fused["w1"].nbytes + fused["w2"].nbytes
                    + fused["w3"].nbytes + fused["b"].nbytes)
    if single_buffer_weights is None:
        single_buffer_weights = weight_bytes > (2 << 20)

    kernel = _make_kernel(A, hidden_pad, h2p, out_pad, split, cdt)

    # Scheduler hint.
    l2_flops = (4 * B_pad * hidden_pad * hidden_pad if split
                else 2 * B_pad * h2p * h2p)
    cost = pl.CostEstimate(
        flops=2 * B_pad * (obs_dim * h2p + h2p * out_pad) + l2_flops,
        transcendentals=2 * B_pad * h2p,
        bytes_accessed=obs.nbytes + weight_bytes + B_pad * (A + 1) * 4)

    # Only raise the scoped VMEM limit when the footprint actually needs it
    # (v7x: 64 MiB physical / 32 MiB default scoped).
    act_bytes = TB * (obs_dim * obs.dtype.itemsize + (A + 1) * 4 + 3 * h2p * 4)
    need = weight_bytes * (1 if single_buffer_weights else 2) + 2 * act_bytes
    vmem_limit = min(int(need * 1.25), 60 << 20) if need > (24 << 20) else None

    def run(single_buf):
        pm = pl.Buffered(1) if single_buf else None

        def const_spec(arr):
            nd = arr.ndim
            return pl.BlockSpec(arr.shape, lambda i, _nd=nd: (0,) * _nd,
                                pipeline_mode=pm)

        call = pl.pallas_call(
            kernel,
            out_shape=(jax.ShapeDtypeStruct((B_pad, A), jnp.float32),
                       jax.ShapeDtypeStruct((B_pad, 1), jnp.float32)),
            grid=(num_tiles,),
            in_specs=[
                pl.BlockSpec((TB, obs_dim), lambda i: (i, 0)),   # obs tile
                const_spec(fused["w1"]),                          # fused W1
                const_spec(fused["w2"]),                          # W2 (fused or stacked pair)
                const_spec(fused["w3"]),                          # fused W3
                const_spec(fused["b"]),                           # stacked biases
            ],
            out_specs=(pl.BlockSpec((TB, A), lambda i: (i, 0)),   # mean
                       pl.BlockSpec((TB, 1), lambda i: (i, 0))),  # value
            compiler_params=pltpu.CompilerParams(
                dimension_semantics=("parallel",),
                vmem_limit_bytes=vmem_limit),
            cost_estimate=cost,
        )
        return call(obs, fused["w1"], fused["w2"], fused["w3"], fused["b"])

    if single_buffer_weights:
        try:
            mean, value = run(True)
        except Exception:
            # pl.Buffered(1) unavailable on this JAX build -> default 2 bufs.
            mean, value = run(False)
    else:
        mean, value = run(False)

    mean = mean[:B]
    value = value[:B]
    # Normal(mean, exp(log_std)): scale is batch-independent -> wrapper side.
    std = jnp.broadcast_to(jnp.exp(log_std), mean.shape)
    return mean, std, value


def init_params(key, obs_dim, hidden, action_dim):
    """Deterministic synthetic init (shapes match nn.Linear layers)."""
    ks = jax.random.split(key, 6)

    def linear(k, fan_in, fan_out):
        # [in, out] layout so kernel does x @ W + b (== PyTorch x @ W.T).
        scale = 1.0 / jnp.sqrt(fan_in)
        w = jax.random.uniform(k, (fan_in, fan_out), jnp.float32, -scale, scale)
        b = jnp.zeros((1, fan_out), jnp.float32)
        return w, b

    pw1, pb1 = linear(ks[0], obs_dim, hidden)
    pw2, pb2 = linear(ks[1], hidden, hidden)
    pw3, pb3 = linear(ks[2], hidden, action_dim)
    vw1, vb1 = linear(ks[3], obs_dim, hidden)
    vw2, vb2 = linear(ks[4], hidden, hidden)
    vw3, vb3 = linear(ks[5], hidden, 1)

    return {"pi_w1": pw1, "pi_b1": pb1, "pi_w2": pw2, "pi_b2": pb2,
            "pi_w3": pw3, "pi_b3": pb3,
            "v_w1": vw1, "v_b1": vb1, "v_w2": vw2, "v_b2": vb2,
            "v_w3": vw3, "v_b3": vb3}


def reference_forward(obs, params, log_std):
    h = jnp.tanh(obs @ params["pi_w1"] + params["pi_b1"])
    h = jnp.tanh(h @ params["pi_w2"] + params["pi_b2"])
    mean = h @ params["pi_w3"] + params["pi_b3"]
    std = jnp.broadcast_to(jnp.exp(log_std), mean.shape)
    g = jnp.tanh(obs @ params["v_w1"] + params["v_b1"])
    g = jnp.tanh(g @ params["v_w2"] + params["v_b2"])
    value = g @ params["v_w3"] + params["v_b3"]
    return mean, std, value


if __name__ == "__main__":
    key = jax.random.PRNGKey(0)
    k_obs, k_params, k_obs2, k_params2 = jax.random.split(key, 4)

    # --- small config (block-diag layer-2 path) ---------------------------
    B, OBS_DIM, HIDDEN, ACTION_DIM = 8, 16, 32, 4
    obs = jax.random.normal(k_obs, (B, OBS_DIM), jnp.float32)
    params = init_params(k_params, OBS_DIM, HIDDEN, ACTION_DIM)
    log_std = jnp.full((1, ACTION_DIM), jnp.log(1.0), jnp.float32)  # initial_std=1
    ref_mean, ref_std, ref_value = reference_forward(obs, params, log_std)

    # (a) f32 path: proves the fused packing is exact.
    fused32 = pack_fused_params(params, OBS_DIM, HIDDEN, ACTION_DIM,
                                compute_dtype=jnp.float32)
    mean, std, value = jax.block_until_ready(ppo_forward(obs, fused32, log_std))
    assert jnp.allclose(mean, ref_mean, atol=1e-5)
    assert jnp.allclose(std, ref_std, atol=1e-5)
    assert jnp.allclose(value, ref_value, atol=1e-5)

    # (b) bf16 path (production config: native MXU rate on v6e/v7x).
    fused16 = pack_fused_params(params, OBS_DIM, HIDDEN, ACTION_DIM,
                                compute_dtype=jnp.bfloat16)
    mean, std, value = jax.block_until_ready(ppo_forward(obs, fused16, log_std))
    assert jnp.allclose(mean, ref_mean, atol=5e-2, rtol=5e-2)
    assert jnp.allclose(std, ref_std, atol=1e-5)
    assert jnp.allclose(value, ref_value, atol=5e-2, rtol=5e-2)

    # (c) wider config: exercises the split layer-2 path (HIDDEN >= 128) and
    #     single-buffered resident weights.
    B2, OBS2, HID2, ACT2 = 36, 24, 256, 6
    obs2 = jax.random.normal(k_obs2, (B2, OBS2), jnp.float32)
    params2 = init_params(k_params2, OBS2, HID2, ACT2)
    log_std2 = jnp.full((1, ACT2), jnp.log(0.5), jnp.float32)
    ref2 = reference_forward(obs2, params2, log_std2)
    fused2 = pack_fused_params(params2, OBS2, HID2, ACT2,
                               compute_dtype=jnp.bfloat16)
    out2 = jax.block_until_ready(
        ppo_forward(obs2, fused2, log_std2, single_buffer_weights=True))
    for got, want in zip(out2, ref2):
        assert jnp.allclose(got, want, atol=7e-2, rtol=7e-2)

    # TODO(synk): dist.sample()/log_prob (get_action) need RNG + log-pdf; only
    # the deterministic forward (mean, std, value) is fused in the kernel.
    print("KERNEL_OK")
</pallas_src>

<mosaic_0001>
module attributes {stable_mosaic.version = 11 : i64} {
  func.func @kernel(%arg0: i32, %arg1: memref<8x16xf32, #tpu.memory_space<vmem>>, %arg2: memref<16x128xf32, #tpu.memory_space<vmem>>, %arg3: memref<128x128xf32, #tpu.memory_space<vmem>>, %arg4: memref<128x128xf32, #tpu.memory_space<vmem>>, %arg5: memref<3x128xf32, #tpu.memory_space<vmem>>, %arg6: memref<8x4xf32, #tpu.memory_space<vmem>>, %arg7: memref<8x1xf32, #tpu.memory_space<vmem>>) attributes {dimension_semantics = [#tpu.dimension_semantics<parallel>], iteration_bounds = array<i64: 1>, scalar_prefetch = 0 : i64, scratch_operands = 0 : i64, tpu.core_type = #tpu.core_type<tc>, window_params = [{transform_indices = @transform_0, window_bounds = array<i64: 8, 16>}, {pipeline_mode = #tpu.pipeline_mode<synchronous>, transform_indices = @transform_1, window_bounds = array<i64: 16, 128>}, {pipeline_mode = #tpu.pipeline_mode<synchronous>, transform_indices = @transform_2, window_bounds = array<i64: 128, 128>}, {pipeline_mode = #tpu.pipeline_mode<synchronous>, transform_indices = @transform_3, window_bounds = array<i64: 128, 128>}, {pipeline_mode = #tpu.pipeline_mode<synchronous>, transform_indices = @transform_4, window_bounds = array<i64: 3, 128>}, {transform_indices = @transform_5, window_bounds = array<i64: 8, 4>}, {transform_indices = @transform_6, window_bounds = array<i64: 8, 1>}]} {
    %c0 = arith.constant 0 : index
    %c0_0 = arith.constant 0 : index
    %0 = vector.load %arg1[%c0, %c0_0] : memref<8x16xf32, #tpu.memory_space<vmem>>, vector<8x16xf32>
    %c0_1 = arith.constant 0 : index
    %c0_2 = arith.constant 0 : index
    %1 = vector.load %arg2[%c0_1, %c0_2] : memref<16x128xf32, #tpu.memory_space<vmem>>, vector<16x128xf32>
    %cst = arith.constant dense<0.000000e+00> : vector<8x128xf32>
    %2 = tpu.matmul %0, %1, %cst {dimension_numbers = #tpu.dot_dimension_numbers<[1], [0], [0], [1], [0, 0, 1, 1], [], []>} : vector<8x16xf32>, vector<16x128xf32>, vector<8x128xf32> -> vector<8x128xf32>
    %c0_3 = arith.constant 0 : index
    %c0_4 = arith.constant 0 : index
    %3 = vector.load %arg5[%c0_3, %c0_4] : memref<3x128xf32, #tpu.memory_space<vmem>>, vector<1x128xf32>
    %4 = vector.broadcast %3 : vector<1x128xf32> to vector<8x128xf32>
    %5 = arith.addf %2, %4 : vector<8x128xf32>
    %6 = math.tanh %5 : vector<8x128xf32>
    %c0_5 = arith.constant 0 : index
    %c0_6 = arith.constant 0 : index
    %7 = vector.load %arg3[%c0_5, %c0_6] : memref<128x128xf32, #tpu.memory_space<vmem>>, vector<128x128xf32>
    %cst_7 = arith.constant dense<0.000000e+00> : vector<8x128xf32>
    %8 = tpu.matmul %6, %7, %cst_7 {dimension_numbers = #tpu.dot_dimension_numbers<[1], [0], [0], [1], [0, 0, 1, 1], [], []>} : vector<8x128xf32>, vector<128x128xf32>, vector<8x128xf32> -> vector<8x128xf32>
    %c1 = arith.constant 1 : index
    %c0_8 = arith.constant 0 : index
    %9 = vector.load %arg5[%c1, %c0_8] : memref<3x128xf32, #tpu.memory_space<vmem>>, vector<1x128xf32>
    %10 = vector.broadcast %9 : vector<1x128xf32> to vector<8x128xf32>
    %11 = arith.addf %8, %10 : vector<8x128xf32>
    %12 = math.tanh %11 : vector<8x128xf32>
    %c0_9 = arith.constant 0 : index
    %c0_10 = arith.constant 0 : index
    %13 = vector.load %arg4[%c0_9, %c0_10] : memref<128x128xf32, #tpu.memory_space<vmem>>, vector<128x128xf32>
    %cst_11 = arith.constant dense<0.000000e+00> : vector<8x128xf32>
    %14 = tpu.matmul %12, %13, %cst_11 {dimension_numbers = #tpu.dot_dimension_numbers<[1], [0], [0], [1], [0, 0, 1, 1], [], []>} : vector<8x128xf32>, vector<128x128xf32>, vector<8x128xf32> -> vector<8x128xf32>
    %c2 = arith.constant 2 : index
    %c0_12 = arith.constant 0 : index
    %15 = vector.load %arg5[%c2, %c0_12] : memref<3x128xf32, #tpu.memory_space<vmem>>, vector<1x128xf32>
    %16 = vector.broadcast %15 : vector<1x128xf32> to vector<8x128xf32>
    %17 = arith.addf %14, %16 : vector<8x128xf32>
    %18 = vector.extract_strided_slice %17 {offsets = [0, 0], sizes = [8, 4], strides = [1, 1]} : vector<8x128xf32> to vector<8x4xf32>
    %c0_13 = arith.constant 0 : index
    %c0_14 = arith.constant 0 : index
    %19 = vector.load %arg6[%c0_13, %c0_14] : memref<8x4xf32, #tpu.memory_space<vmem>>, vector<8x4xf32>
    tpu.vector_store %arg6[%c0_13, %c0_14], %18 {strides = array<i32>} : memref<8x4xf32, #tpu.memory_space<vmem>>, vector<8x4xf32>,
    %20 = vector.extract_strided_slice %17 {offsets = [0, 4], sizes = [8, 1], strides = [1, 1]} : vector<8x128xf32> to vector<8x1xf32>
    %c0_15 = arith.constant 0 : index
    %c0_16 = arith.constant 0 : index
    %21 = vector.load %arg7[%c0_15, %c0_16] : memref<8x1xf32, #tpu.memory_space<vmem>>, vector<8x1xf32>
    tpu.vector_store %arg7[%c0_15, %c0_16], %20 {strides = array<i32>} : memref<8x1xf32, #tpu.memory_space<vmem>>, vector<8x1xf32>,
    return
  }
  func.func @transform_0(%arg0: i32) -> (i32, i32) {
    %c0_i32 = arith.constant 0 : i32
    %c0_i32_0 = arith.constant 0 : i32
    return %arg0, %c0_i32 : i32, i32
  }
  func.func @transform_1(%arg0: i32) -> (i32, i32) {
    %c0_i32 = arith.constant 0 : i32
    %c0_i32_0 = arith.constant 0 : i32
    %c0_i32_1 = arith.constant 0 : i32
    return %c0_i32, %c0_i32_0 : i32, i32
  }
  func.func @transform_2(%arg0: i32) -> (i32, i32) {
    %c0_i32 = arith.constant 0 : i32
    %c0_i32_0 = arith.constant 0 : i32
    %c0_i32_1 = arith.constant 0 : i32
    return %c0_i32, %c0_i32_0 : i32, i32
  }
  func.func @transform_3(%arg0: i32) -> (i32, i32) {
    %c0_i32 = arith.constant 0 : i32
    %c0_i32_0 = arith.constant 0 : i32
    %c0_i32_1 = arith.constant 0 : i32
    return %c0_i32, %c0_i32_0 : i32, i32
  }
  func.func @transform_4(%arg0: i32) -> (i32, i32) {
    %c0_i32 = arith.constant 0 : i32
    %c0_i32_0 = arith.constant 0 : i32
    %c0_i32_1 = arith.constant 0 : i32
    return %c0_i32, %c0_i32_0 : i32, i32
  }
  func.func @transform_5(%arg0: i32) -> (i32, i32) {
    %c0_i32 = arith.constant 0 : i32
    %c0_i32_0 = arith.constant 0 : i32
    return %arg0, %c0_i32 : i32, i32
  }
  func.func @transform_6(%arg0: i32) -> (i32, i32) {
    %c0_i32 = arith.constant 0 : i32
    %c0_i32_0 = arith.constant 0 : i32
    return %arg0, %c0_i32 : i32, i32
  }
}

</mosaic_0001>

<bundles_post_ra>
// kernel: tpu_custom_call.1
= control target key start
LH: loop header
LB: loop body
LE: loop exit
PB: predicated region body
PF: predicated region fallthrough
CT: control target
= control target key end

     0   :  { %12 = vsyncpa [#allocation3], 0  ;;  %s697_s0 = inlined_call_operand.hbm [shape: f32[8,16], index: 0, kind: input, shape index: {}]   ;;  %s698_s1 = inlined_call_operand.hbm [shape: f32[16,128], index: 1, kind: input, shape index: {}]   ;;  %s699_s2 = inlined_call_operand.hbm [shape: f32[128,128], index: 2, kind: input, shape index: {}]   ;;  %s700_s3 = inlined_call_operand.hbm [shape: f32[128,128], index: 3, kind: input, shape index: {}]   ;;  %s701_s4 = inlined_call_operand.vmem [shape: f32[3,128], index: 4, kind: input, shape index: {}]   ;;  %s702_s5 = inlined_call_operand.vmem [shape: f32[8,4], index: 5, kind: output, shape index: {0}]   ;;  %s703_s6 = inlined_call_operand.vmem [shape: f32[8,1], index: 6, kind: output, shape index: {1}]  }
   0x1   :  { %13 = vsyncpa [#allocation5], 0 }
   0x2   :  { %14 = vsyncpa [#allocation8], 0  ;;  %s577_s21 = smov [#allocation4]  }
   0x3   :  { %s30_s22 = sshll.u32 %s577_s21, 4  ;;  %s31_s22 = int_to_ptr.vmem [resolvable:$true] %s30_s22 }
   0x4   :  { %s499_s23 = scalar_lea.vmem %s31_s22, 256  ;;  %p504_p1 = scmp.lt.s32.totalorder %s31_s22, %s31_s22 }
   0x5   :  { %p500_p0 = scmp.ne.s32.totalorder %s31_s22, %s499_s23  ;;  %p505_p2 = scmp.lt.s32.totalorder %s499_s23, %s499_s23 }
   0x7   :  { %p506_p3 = por %p505_p2, %p504_p1 }
   0x9   :  { %p507_p4 = pnand %p506_p3, %p500_p0 }
   0xb   :  { %510 = shalt.err (!%p507_p4)
}
   0xc   :  { %s578_s24 = smov 128   ;;  %s579_s25 = smov 8  }
   0xd   :  { %36 = dma.hbm_to_vmem [thread:$0]  %s698_s1, 256, %s31_s22, [#allocation5], %s578_s24, %s578_s24, %s579_s25  }
   0xe   :  { %s580_s28 = smov [#allocation2]   ;;  %s581_s30 = smov [#allocation6]  }
   0xf   :  { %s21_s29 = sshll.u32 %s580_s28, 4  ;;  %s42_s7 = sshll.u32 %s581_s30, 4  ;;  %s22_s29 = int_to_ptr.vmem [resolvable:$true] %s21_s29  ;;  %s43_s7 = int_to_ptr.vmem [resolvable:$true] %s42_s7 }
  0x10   :  { %s519_s8 = scalar_lea.vmem %s22_s29, 128  ;;  %p524_p6 = scmp.lt.s32.totalorder %s22_s29, %s22_s29 }
  0x11   :  { %p520_p5 = scmp.ne.s32.totalorder %s22_s29, %s519_s8  ;;  %p525_p7 = scmp.lt.s32.totalorder %s519_s8, %s519_s8 }
  0x13   :  { %p526_p8 = por %p525_p7, %p524_p6 }
  0x15   :  { %p527_p9 = pnand %p526_p8, %p520_p5 }
  0x17   :  { %530 = shalt.err (!%p527_p9)
}
  0x18   :  { %24 = dma.hbm_to_vmem [thread:$0]  %s697_s0, 128, %s22_s29, [#allocation3]  }
  0x19   :  { %s539_s11 = scalar_lea.vmem %s43_s7, 2048  ;;  %p544_p11 = scmp.lt.s32.totalorder %s43_s7, %s43_s7 }
  0x1a   :  { %p540_p10 = scmp.ne.s32.totalorder %s43_s7, %s539_s11  ;;  %p545_p12 = scmp.lt.s32.totalorder %s539_s11, %s539_s11 }
  0x1c   :  { %p546_p13 = por %p545_p12, %p544_p11 }
  0x1e   :  { %p547_p0 = pnand %p546_p13, %p540_p10 }
  0x20   :  { %550 = shalt.err (!%p547_p0)
}
  0x21   :  { %48 = dma.hbm_to_vmem [thread:$0]  %s699_s2, 2048, %s43_s7, [#allocation5], %s578_s24, %s578_s24, %s579_s25  }
  0x22   :  { %s582_s13 = smov [#allocation7]  }
  0x23   :  { %s54_s14 = sshll.u32 %s582_s13, 4  ;;  %s55_s14 = int_to_ptr.vmem [resolvable:$true] %s54_s14 }
  0x24   :  { %s559_s15 = scalar_lea.vmem %s55_s14, 2048  ;;  %p564_p2 = scmp.lt.s32.totalorder %s55_s14, %s55_s14 }
  0x25   :  { %p560_p1 = scmp.ne.s32.totalorder %s55_s14, %s559_s15  ;;  %p565_p3 = scmp.lt.s32.totalorder %s559_s15, %s559_s15 }
  0x27   :  { %p566_p4 = por %p565_p3, %p564_p2 }
  0x29   :  { %p567_p5 = pnand %p566_p4, %p560_p1 }
  0x2b   :  { %570 = shalt.err (!%p567_p5)
}
  0x2c   :  { %60 = dma.hbm_to_vmem [thread:$0]  %s700_s3, 2048, %s55_s14, [#allocation8], %s578_s24, %s578_s24, %s579_s25  }
  0x2d   :  { %571 = dma.done.wait [#allocation3], 128  }
  0x2e   :  { %572 = vsyncadd [#allocation3], 4294967168 }
  0x2f   :  { %573 = dma.done.wait [#allocation5], 2304  }
  0x30   :  { %574 = vsyncadd [#allocation5], 4294964992 }
  0x31   :  { %575 = dma.done.wait [#allocation8], 2048  }
  0x32   :  { %576 = vsyncadd [#allocation8], 4294965248  ;;  %v583_v0 = vmov 0.0   ;;  %vm584_vm0 = vmmov 0   ;;  %v77_v1 = vld [vmem:[#allocation4 + $0x8] sm:$0xff]  ;;  %v76_v2 = vld [vmem:[#allocation4] sm:$0xff] }
  0x33   :  { %401 = vmatprep.subr.mxu0 %v583_v0  ;;  %405 = vmatprep.mubr.msk.f32.mxu0 %vm584_vm0, %v583_v0  ;;  %v75_v3 = vld [vmem:[#allocation2] sm:$0xff]  ;;  %vm83_vm1 = vcmask 130048   ;;  %v173_v4 = vld [vmem:[#allocation6 + $0x78] sm:$0xff]  ;;  %v172_v5 = vld [vmem:[#allocation6 + $0x70] sm:$0xff]  ;;  %vm341_vm2 = vcmask 31744   ;;  %s585_s23 = smov 124  }
  0x34   :  { %408 = vmatprep.subr.mxu1 %v583_v0  ;;  %440 = vmatprep.mubr.msk.f32.mxu1 %vm584_vm0, %v583_v0  ;;  %v171_v6 = vld [vmem:[#allocation6 + $0x68] sm:$0xff]  ;;  %v170_v7 = vld [vmem:[#allocation6 + $0x60] sm:$0xff]  ;;  %v169_v8 = vld [vmem:[#allocation6 + $0x58] sm:$0xff]  ;;  %vm347_vm3 = vcmask 7168  }
  0x35   :  { %402 = vmatpush3.msra.mxu0 %v77_v1  ;;  %409 = vmatpush3.msra.mxu1 %v173_v4  ;;  %v168_v9 = vld [vmem:[#allocation6 + $0x50] sm:$0xff]  ;;  %v167_v10 = vld [vmem:[#allocation6 + $0x48] sm:$0xff]  ;;  %v166_v11 = vld [vmem:[#allocation6 + $0x40] sm:$0xff] }
  0x36   :  { %403 = vmatprep.subr.mxu0 %v583_v0  ;;  %410 = vmatprep.subr.mxu1 %v583_v0  ;;  %v165_v12 = vld [vmem:[#allocation6 + $0x38] sm:$0xff]  ;;  %v164_v13 = vld [vmem:[#allocation6 + $0x30] sm:$0xff]  ;;  %v163_v14 = vld [vmem:[#allocation6 + $0x28] sm:$0xff] }
  0x37   :  { %404 = vmatpush3.msra.mxu0 %v76_v2  ;;  %411 = vmatpush3.msra.mxu1 %v172_v5  ;;  %v162_v15 = vld [vmem:[#allocation6 + $0x20] sm:$0xff]  ;;  %v161_v16 = vld [vmem:[#allocation6 + $0x18] sm:$0xff]  ;;  %v160_v17 = vld [vmem:[#allocation6 + $0x10] sm:$0xff] }
  0x38   :  { %406 = vmatmul.mubr.msk.f32.vlgmr.msra.gmra.mxu0 %vm83_vm1, %v75_v3  ;;  %412 = vmatprep.subr.mxu1 %v583_v0  ;;  %v159_v18 = vld [vmem:[#allocation6 + $0x8] sm:$0xff]  ;;  %v158_v19 = vld [vmem:[#allocation6] sm:$0xff]  ;;  %v265_v20 = vld [vmem:[#allocation7 + $0x78] sm:$0xff] }
  0x39   :  { %443 = vmatprep.subr.mxu0 %v583_v0  ;;  %413 = vmatpush3.msra.mxu1 %v171_v6  ;;  %v264_v21 = vld [vmem:[#allocation7 + $0x70] sm:$0xff]  ;;  %v263_v22 = vld [vmem:[#allocation7 + $0x68] sm:$0xff]  ;;  %v262_v23 = vld [vmem:[#allocation7 + $0x60] sm:$0xff] }
  0x3a   :  { %475 = vmatprep.mubr.msk.f32.mxu0 %vm584_vm0, %v583_v0  ;;  %414 = vmatprep.subr.mxu1 %v583_v0  ;;  %v261_v24 = vld [vmem:[#allocation7 + $0x58] sm:$0xff]  ;;  %v260_v25 = vld [vmem:[#allocation7 + $0x50] sm:$0xff]  ;;  %v259_v26 = vld [vmem:[#allocation7 + $0x48] sm:$0xff] }
  0x3b   :  { %415 = vmatpush3.msra.mxu1 %v170_v7  ;;  %444 = vmatpush3.msra.mxu0 %v265_v20  ;;  %v360_v27 = vld [vmem:[%s701_s4] ss:$0 sm:$0xff]  ;;  %v258_v32 = vld [vmem:[#allocation7 + $0x40] sm:$0xff]  ;;  %v257_v33 = vld [vmem:[#allocation7 + $0x38] sm:$0xff] }
  0x3c   :  { %416 = vmatprep.subr.mxu1 %v583_v0  ;;  %445 = vmatprep.subr.mxu0 %v583_v0  ;;  %v256_v34 = vld [vmem:[#allocation7 + $0x30] sm:$0xff]  ;;  %v255_v35 = vld [vmem:[#allocation7 + $0x28] sm:$0xff]  ;;  %v254_v36 = vld [vmem:[#allocation7 + $0x20] sm:$0xff] }
  0x3d   :  { %417 = vmatpush3.msra.mxu1 %v169_v8  ;;  %446 = vmatpush3.msra.mxu0 %v264_v21  ;;  %v253_v37 = vld [vmem:[#allocation7 + $0x18] sm:$0xff]  ;;  %v252_v38 = vld [vmem:[#allocation7 + $0x10] sm:$0xff]  ;;  %v251_v39 = vld [vmem:[#allocation7 + $0x8] sm:$0xff] }
  0x3e   :  { %418 = vmatprep.subr.mxu1 %v583_v0  ;;  %447 = vmatprep.subr.mxu0 %v583_v0  ;;  %v250_v40 = vld [vmem:[#allocation7] sm:$0xff]  ;;  %v362_v41 = vld [vmem:[%s701_s4 + $0x1] ss:$0 sm:$0xff]  ;;  %v363_v46 = vld [vmem:[%s701_s4 + $0x2] ss:$0 sm:$0xff] }
  0x3f   :  { %419 = vmatpush3.msra.mxu1 %v168_v9  ;;  %448 = vmatpush3.msra.mxu0 %v263_v22 }
  0x40   :  { %420 = vmatprep.subr.mxu1 %v583_v0  ;;  %449 = vmatprep.subr.mxu0 %v583_v0 }
  0x41   :  { %421 = vmatpush3.msra.mxu1 %v167_v10  ;;  %450 = vmatpush3.msra.mxu0 %v262_v23 }
  0x42   :  { %422 = vmatprep.subr.mxu1 %v583_v0  ;;  %451 = vmatprep.subr.mxu0 %v583_v0 }
  0x43   :  { %423 = vmatpush3.msra.mxu1 %v166_v11  ;;  %452 = vmatpush3.msra.mxu0 %v261_v24 }
  0x44   :  { %424 = vmatprep.subr.mxu1 %v583_v0  ;;  %453 = vmatprep.subr.mxu0 %v583_v0 }
  0x45   :  { %425 = vmatpush3.msra.mxu1 %v165_v12  ;;  %454 = vmatpush3.msra.mxu0 %v260_v25 }
  0x46   :  { %426 = vmatprep.subr.mxu1 %v583_v0  ;;  %455 = vmatprep.subr.mxu0 %v583_v0 }
  0x47   :  { %427 = vmatpush3.msra.mxu1 %v164_v13  ;;  %456 = vmatpush3.msra.mxu0 %v259_v26 }
  0x48   :  { %428 = vmatprep.subr.mxu1 %v583_v0  ;;  %457 = vmatprep.subr.mxu0 %v583_v0 }
  0x49   :  { %429 = vmatpush3.msra.mxu1 %v163_v14  ;;  %458 = vmatpush3.msra.mxu0 %v258_v32 }
  0x4a   :  { %430 = vmatprep.subr.mxu1 %v583_v0  ;;  %459 = vmatprep.subr.mxu0 %v583_v0 }
  0x4b   :  { %431 = vmatpush3.msra.mxu1 %v162_v15  ;;  %460 = vmatpush3.msra.mxu0 %v257_v33 }
  0x4c   :  { %432 = vmatprep.subr.mxu1 %v583_v0  ;;  %461 = vmatprep.subr.mxu0 %v583_v0 }
  0x4d   :  { %433 = vmatpush3.msra.mxu1 %v161_v16  ;;  %462 = vmatpush3.msra.mxu0 %v256_v34 }
  0x4e   :  { %434 = vmatprep.subr.mxu1 %v583_v0  ;;  %463 = vmatprep.subr.mxu0 %v583_v0 }
  0x4f   :  { %435 = vmatpush3.msra.mxu1 %v160_v17  ;;  %464 = vmatpush3.msra.mxu0 %v255_v35 }
  0x50   :  { %436 = vmatprep.subr.mxu1 %v583_v0  ;;  %465 = vmatprep.subr.mxu0 %v583_v0 }
  0x51   :  { %437 = vmatpush3.msra.mxu1 %v159_v18  ;;  %466 = vmatpush3.msra.mxu0 %v254_v36 }
  0x52   :  { %438 = vmatprep.subr.mxu1 %v583_v0  ;;  %467 = vmatprep.subr.mxu0 %v583_v0 }
  0x53   :  { %439 = vmatpush3.msra.mxu1 %v158_v19  ;;  %468 = vmatpush3.msra.mxu0 %v253_v37 }
  0x54   :  { %469 = vmatprep.subr.mxu0 %v583_v0 }
  0x55   :  { %470 = vmatpush3.msra.mxu0 %v252_v38 }
  0x56   :  { %471 = vmatprep.subr.mxu0 %v583_v0 }
  0x57   :  { %472 = vmatpush3.msra.mxu0 %v251_v39 }
  0x58   :  { %473 = vmatprep.subr.mxu0 %v583_v0 }
  0x59   :  { %474 = vmatpush3.msra.mxu0 %v250_v40 }
  0xf8   :  { %v153_v28 = vpop.f32.mrf.mxu0 }
  0xf9   :  { %v154_v29 = vadd.f32 %v360_v27, %v153_v28 }
  0xfa   :  { %v407_v30 = vpop.f32.mrf.mxu0 }
  0xfb   :  { %487 = vtanh.f32 %v154_v29 }
 0x108   :  { %v488_v31 = vpop.eup %487 }
 0x109   :  { %441 = vmatmul.mubr.f32.vlgmr.msra.gmra.mxu1 %v488_v31 }
 0x1c9   :  { %v245_v42 = vpop.f32.mrf.mxu1 }
 0x1ca   :  { %v246_v43 = vadd.f32 %v362_v41, %v245_v42 }
 0x1cb   :  { %v442_v44 = vpop.f32.mrf.mxu1 }
 0x1cc   :  { %489 = vtanh.f32 %v246_v43 }
 0x1d9   :  { %v490_v45 = vpop.eup %489 }
 0x1da   :  { %476 = vmatmul.mubr.f32.vlgmr.msra.gmra.mxu0 %v490_v45 }
 0x29a   :  { %v337_v47 = vpop.f32.mrf.mxu0 }
 0x29b   :  { %v338_v48 = vadd.f32 %v363_v46, %v337_v47 }
 0x29c   :  { %v477_v49 = vpop.f32.mrf.mxu0 }
 0x29d   :  { %342 = vst.msk [vmem:[%s702_s5] sm:$0xff] %vm341_vm2, %v338_v48  ;;  %344 = vrot.lane.b32.xlu0 %v338_v48, %s585_s23 }
 0x30f   :  { %v345_v50 = vpop.permute.xlu0 %344 }
 0x310   :  { %348 = vst.msk [vmem:[%s703_s6] sm:$0xff] %vm347_vm3, %v345_v50 }
 0x311   :  { %357 = vsyncpa [#allocation3], 1 }
 0x312   :  { %358 = vsyncpa [#allocation5], 1 }
 0x313   :  { %359 = vsyncpa [#allocation8], 1 }

</bundles_post_ra>
